<compile_context>
chip_gen: v6e
topology: v6e:2x2x1
jax: 0.10.0
libtpu: 0.0.40
codegen_flags: <defaults>
</compile_context>

<pallas_src>
import functools

import jax
import jax.numpy as jnp
from jax.experimental import pallas as pl
from jax.experimental.pallas import tpu as pltpu

_VMEM_LIMIT = 48 * 1024 * 1024  # fits v5e/v6e/v7x scoped budgets with headroom


# --------------------------------------------------------------------------
# Kernels
# --------------------------------------------------------------------------
def _fused_linear_kernel(*refs, has_bias, has_lora):
    """o = x @ wt (+ bias) (+ z @ bcat); k-axis (innermost grid) is the reduction."""
    x_ref, wt_ref = refs[0], refs[1]
    idx = 2
    bias_ref = None
    z_ref = bcat_ref = None
    if has_bias:
        bias_ref = refs[idx]
        idx += 1
    if has_lora:
        z_ref, bcat_ref = refs[idx], refs[idx + 1]
        idx += 2
    o_ref, acc_ref = refs[idx], refs[idx + 1]

    k = pl.program_id(2)

    @pl.when(k == 0)
    def _():
        acc_ref[...] = jnp.zeros_like(acc_ref)

    # Weight is pre-transposed to [K, N]: contraction dims are (last of x, first
    # of wt) -> MXU-native layout, no per-step RHS re-layout.
    acc_ref[...] += jnp.dot(x_ref[...], wt_ref[...],
                            preferred_element_type=jnp.float32)

    @pl.when(k == pl.num_programs(2) - 1)
    def _():
        out = acc_ref[...]
        if has_bias:
            out = out + bias_ref[...].astype(jnp.float32)
        if has_lora:
            # LoRA expand fused into the finalize: z is (tm, Rp), bcat is
            # (Rp, tn); Rp = padded sum of active adapter ranks (small).
            out = out + jnp.dot(z_ref[...], bcat_ref[...],
                                preferred_element_type=jnp.float32)
        o_ref[...] = out.astype(o_ref.dtype)


def _lora_shrink_kernel(x_ref, acat_ref, sm_ref, z_ref, acc_ref):
    """z = (x @ A_cat.T) * (scaling * per-row mask); k-axis is the reduction."""
    k = pl.program_id(1)

    @pl.when(k == 0)
    def _():
        acc_ref[...] = jnp.zeros_like(acc_ref)

    acc_ref[...] += jnp.dot(x_ref[...], acat_ref[...],
                            preferred_element_type=jnp.float32)

    @pl.when(k == pl.num_programs(1) - 1)
    def _():
        z_ref[...] = (acc_ref[...] * sm_ref[...].astype(jnp.float32)).astype(z_ref.dtype)


# --------------------------------------------------------------------------
# pallas_call wrappers
# --------------------------------------------------------------------------
@functools.partial(jax.jit, static_argnames=("tm", "tn", "tk", "has_bias", "has_lora"))
def _fused_linear(x2d, wt, bias_row, z, bcat, *, tm, tn, tk, has_bias, has_lora):
    M, K = x2d.shape
    _, N = wt.shape
    grid = (pl.cdiv(M, tm), pl.cdiv(N, tn), pl.cdiv(K, tk))

    in_specs = [
        pl.BlockSpec((tm, tk), lambda i, j, k: (i, k)),   # X tile
        pl.BlockSpec((tk, tn), lambda i, j, k: (k, j)),   # W.T tile (pre-transposed)
    ]
    inputs = [x2d, wt]
    if has_bias:
        in_specs.append(pl.BlockSpec((1, tn), lambda i, j, k: (0, j)))
        inputs.append(bias_row)
    if has_lora:
        Rp = z.shape[1]
        in_specs.append(pl.BlockSpec((tm, Rp), lambda i, j, k: (i, 0)))   # shrink output
        in_specs.append(pl.BlockSpec((Rp, tn), lambda i, j, k: (0, j)))   # B_cat.T
        inputs.extend([z, bcat])

    flops = 2 * M * N * K + (2 * M * N * z.shape[1] if has_lora else 0)
    bytes_accessed = M * N * x2d.dtype.itemsize
    for a in inputs:
        bytes_accessed += a.size * a.dtype.itemsize

    return pl.pallas_call(
        functools.partial(_fused_linear_kernel, has_bias=has_bias, has_lora=has_lora),
        out_shape=jax.ShapeDtypeStruct((M, N), x2d.dtype),
        grid_spec=pltpu.PrefetchScalarGridSpec(
            num_scalar_prefetch=0,
            grid=grid,
            in_specs=in_specs,
            out_specs=pl.BlockSpec((tm, tn), lambda i, j, k: (i, j)),
            scratch_shapes=[pltpu.VMEM((tm, tn), jnp.float32)],
        ),
        compiler_params=pltpu.CompilerParams(
            dimension_semantics=("parallel", "parallel", "arbitrary"),
            vmem_limit_bytes=_VMEM_LIMIT,
        ),
        cost_estimate=pl.CostEstimate(
            flops=flops, transcendentals=0, bytes_accessed=bytes_accessed),
    )(*inputs)


@functools.partial(jax.jit, static_argnames=("tm", "tk"))
def _lora_shrink(x2d, acat_t, scalemask, *, tm, tk):
    M, K = x2d.shape
    Rp = acat_t.shape[1]
    grid = (pl.cdiv(M, tm), pl.cdiv(K, tk))
    bytes_accessed = (x2d.size * x2d.dtype.itemsize
                      + acat_t.size * acat_t.dtype.itemsize
                      + scalemask.size * scalemask.dtype.itemsize
                      + M * Rp * x2d.dtype.itemsize)
    return pl.pallas_call(
        _lora_shrink_kernel,
        out_shape=jax.ShapeDtypeStruct((M, Rp), x2d.dtype),
        grid_spec=pltpu.PrefetchScalarGridSpec(
            num_scalar_prefetch=0,
            grid=grid,
            in_specs=[
                pl.BlockSpec((tm, tk), lambda i, k: (i, k)),   # X tile
                pl.BlockSpec((tk, Rp), lambda i, k: (k, 0)),   # A_cat.T tile
                pl.BlockSpec((tm, Rp), lambda i, k: (i, 0)),   # scaling*mask tile
            ],
            out_specs=pl.BlockSpec((tm, Rp), lambda i, k: (i, 0)),
            scratch_shapes=[pltpu.VMEM((tm, Rp), jnp.float32)],
        ),
        compiler_params=pltpu.CompilerParams(
            dimension_semantics=("parallel", "arbitrary"),
            vmem_limit_bytes=_VMEM_LIMIT,
        ),
        cost_estimate=pl.CostEstimate(
            flops=2 * M * Rp * K, transcendentals=0, bytes_accessed=bytes_accessed),
    )(x2d, acat_t, scalemask)


# --------------------------------------------------------------------------
# Python wrapper (module forward)
# --------------------------------------------------------------------------
def _round_up(v, m):
    return (v + m - 1) // m * m


def _pad_axis(a, axis, target):
    pad = target - a.shape[axis]
    if pad == 0:
        return a
    widths = [(0, 0)] * a.ndim
    widths[axis] = (0, pad)
    return jnp.pad(a, widths)


def blora_column_parallel_linear(x, weight, bias=None, *,
                                 lora_A=None, lora_B=None, scaling=None,
                                 lora_masks=None, skip_bias_add=False,
                                 tm=None, tn=None, tk=None):
    """Forward of BLoraColumnParallelLinear for tp_size == 1.

    Args:
      x:          [batch, seq, input_size]  (or [..., input_size] if no LoRA)
      weight:     [output_size, input_size]
      bias:       [output_size] or None
      lora_A:     dict id -> [r, input_size]
      lora_B:     dict id -> [output_size, r]
      scaling:    dict id -> float
      lora_masks: dict id -> [batch]  (per-request adapter mask)
    Returns:
      (output, output_bias) matching the PyTorch module.
    """
    previous_dtype = x.dtype
    N, K = weight.shape
    lead = x.shape[:-1]
    M = 1
    for d in lead:
        M *= d
    x2d = x.reshape(M, K)

    # Tile defaults: big K/N tiles for HBM efficiency / MXU feeding, tm capped
    # so VMEM stays small and the parallel grid axes keep extent > 1.
    tm = tm or min(256, _round_up(M, 8))
    tn = tn or min(512, _round_up(N, 128))
    tk = tk or min(512, _round_up(K, 128))

    Mp, Np, Kp = _round_up(M, tm), _round_up(N, tn), _round_up(K, tk)

    # One-time weight re-layout to [K, N] (MXU-native RHS; for inference
    # weights this cost is amortized / can be done at load time).
    wt = weight.T
    x2d_p = _pad_axis(_pad_axis(x2d, 0, Mp), 1, Kp)
    wt_p = _pad_axis(_pad_axis(wt, 0, Kp), 1, Np)

    has_bias = (bias is not None) and (not skip_bias_add)
    bias_row = None
    if has_bias:
        # Keep bias at its own (typically f32) dtype -- no precision loss.
        bias_row = _pad_axis(bias.reshape(1, N), 1, Np)

    # ---- B-LoRA: concatenate all active adapters into one shrink + expand ----
    active = []
    if lora_masks and lora_A:
        active = [lid for lid in lora_masks if lid in lora_A]
    has_lora = len(active) > 0

    z_p = None
    bcat_p = None
    if has_lora:
        lora_dtype = lora_A[active[0]].dtype
        x_lora = x2d_p.astype(lora_dtype)                 # x.to(lora dtype)
        acat_t = jnp.concatenate([lora_A[lid].T.astype(lora_dtype) for lid in active],
                                 axis=1)                  # [K, R_total]
        bcat_t = jnp.concatenate([lora_B[lid].T.astype(lora_dtype) for lid in active],
                                 axis=0)                  # [R_total, N]
        batch = lead[0] if lead else 1
        seq = M // batch
        cols = []
        for lid in active:
            row_mask = jnp.repeat(lora_masks[lid].astype(lora_dtype), seq)   # [M]
            r = lora_A[lid].shape[0]
            cols.append(jnp.broadcast_to((scaling[lid] * row_mask)[:, None], (M, r)))
        scalemask = jnp.concatenate(cols, axis=1)         # [M, R_total]

        # Pad the concatenated rank to a multiple of 128 so the shrink output
        # is lane-dense and the expand contraction is MXU-aligned; the padded
        # columns are zero and contribute nothing.
        R_total = acat_t.shape[1]
        Rp = _round_up(R_total, 128)

        acat_t_p = _pad_axis(_pad_axis(acat_t, 0, Kp), 1, Rp)
        bcat_p = _pad_axis(_pad_axis(bcat_t, 0, Rp), 1, Np)
        sm_p = _pad_axis(_pad_axis(scalemask, 0, Mp), 1, Rp)
        z_p = _lora_shrink(x_lora, acat_t_p, sm_p, tm=tm, tk=tk)

    out2d = _fused_linear(x2d_p, wt_p, bias_row, z_p, bcat_p,
                          tm=tm, tn=tn, tk=tk,
                          has_bias=has_bias, has_lora=has_lora)
    out2d = out2d[:M, :N]
    output = out2d.reshape(*lead, N).astype(previous_dtype)

    output_bias = None
    if skip_bias_add and bias is not None:
        output_bias = bias.astype(previous_dtype)
    return output, output_bias


# --------------------------------------------------------------------------
# Demo / correctness check
# --------------------------------------------------------------------------
if __name__ == "__main__":
    input_size, output_size = 256, 128
    batch, seq = 2, 8
    r, lora_alpha = 16, 32

    key = jax.random.PRNGKey(0)
    kx, kw, kb, ka1, kb1, ka2, kb2 = jax.random.split(key, 7)

    x = jax.random.normal(kx, (batch, seq, input_size), dtype=jnp.float32)
    weight = jax.random.normal(kw, (output_size, input_size), dtype=jnp.float32) * 0.02
    bias = jax.random.normal(kb, (output_size,), dtype=jnp.float32) * 0.1

    lora_A = {
        "adp0": jax.random.normal(ka1, (r, input_size), dtype=jnp.float32) * 0.02,
        "adp1": jax.random.normal(ka2, (r, input_size), dtype=jnp.float32) * 0.02,
    }
    lora_B = {
        "adp0": jax.random.normal(kb1, (output_size, r), dtype=jnp.float32) * 0.02,
        "adp1": jax.random.normal(kb2, (output_size, r), dtype=jnp.float32) * 0.02,
    }
    scaling = {"adp0": lora_alpha / r, "adp1": lora_alpha / r}
    lora_masks = {
        "adp0": jnp.array([1.0, 0.0], dtype=jnp.float32),
        "adp1": jnp.array([0.0, 1.0], dtype=jnp.float32),
        "missing": jnp.array([1.0, 1.0], dtype=jnp.float32),  # not in lora_A -> skipped
    }

    # --- forward (bias added) ---
    out, out_bias = blora_column_parallel_linear(
        x, weight, bias, lora_A=lora_A, lora_B=lora_B, scaling=scaling,
        lora_masks=lora_masks, skip_bias_add=False)
    out = jax.block_until_ready(out)

    # --- pure-JAX reference (== module semantics) ---
    ref = jnp.einsum("bsk,nk->bsn", x, weight) + bias
    lora_ref = jnp.zeros_like(ref)
    for lid, m in lora_masks.items():
        if lid in lora_A:
            z_ref = jnp.einsum("bsk,rk->bsr", x, lora_A[lid])
            lr = scaling[lid] * jnp.einsum("bsr,nr->bsn", z_ref, lora_B[lid])
            lora_ref = lora_ref + lr * m[:, None, None]
    ref = ref + lora_ref

    assert out.shape == (batch, seq, output_size)
    assert out_bias is None
    assert jnp.allclose(out, ref, atol=2e-3, rtol=2e-3), float(jnp.max(jnp.abs(out - ref)))

    # --- skip_bias_add path ---
    out2, out_bias2 = blora_column_parallel_linear(
        x, weight, bias, lora_A=lora_A, lora_B=lora_B, scaling=scaling,
        lora_masks=lora_masks, skip_bias_add=True)
    out2 = jax.block_until_ready(out2)
    assert out_bias2 is not None
    assert jnp.allclose(out2 + out_bias2, ref, atol=2e-3, rtol=2e-3)

    # --- no-LoRA path (plain ColumnParallelLinear) ---
    out3, _ = blora_column_parallel_linear(x, weight, bias)
    out3 = jax.block_until_ready(out3)
    ref3 = jnp.einsum("bsk,nk->bsn", x, weight) + bias
    assert jnp.allclose(out3, ref3, atol=2e-3, rtol=2e-3)

    print("KERNEL_OK")
</pallas_src>

<mosaic_0001>
module attributes {stable_mosaic.version = 11 : i64} {
  func.func @_lora_shrink_kernel(%arg0: i32, %arg1: i32, %arg2: memref<16x256xf32, #tpu.memory_space<vmem>>, %arg3: memref<256x128xf32, #tpu.memory_space<vmem>>, %arg4: memref<16x128xf32, #tpu.memory_space<vmem>>, %arg5: memref<16x128xf32, #tpu.memory_space<vmem>>, %arg6: memref<16x128xf32, #tpu.memory_space<vmem>>) attributes {dimension_semantics = [#tpu.dimension_semantics<parallel>, #tpu.dimension_semantics<arbitrary>], iteration_bounds = array<i64: 1, 1>, scalar_prefetch = 0 : i64, scratch_operands = 1 : i64, tpu.core_type = #tpu.core_type<tc>, window_params = [{transform_indices = @transform_0, window_bounds = array<i64: 16, 256>}, {transform_indices = @transform_1, window_bounds = array<i64: 256, 128>}, {transform_indices = @transform_2, window_bounds = array<i64: 16, 128>}, {transform_indices = @transform_3, window_bounds = array<i64: 16, 128>}]} {
    %c0_i32 = arith.constant 0 : i32
    %0 = arith.cmpi eq, %arg1, %c0_i32 : i32
    %1 = arith.extui %0 : i1 to i32
    %c0_i32_0 = arith.constant 0 : i32
    %2 = arith.cmpi ne, %1, %c0_i32_0 : i32
    scf.if %2 {
      %cst_10 = arith.constant 0.000000e+00 : f32
      %12 = vector.broadcast %cst_10 : f32 to vector<16x128xf32>
      %c0_11 = arith.constant 0 : index
      %c0_12 = arith.constant 0 : index
      %13 = vector.load %arg6[%c0_11, %c0_12] : memref<16x128xf32, #tpu.memory_space<vmem>>, vector<16x128xf32>
      tpu.vector_store %arg6[%c0_11, %c0_12], %12 {strides = array<i32>} : memref<16x128xf32, #tpu.memory_space<vmem>>, vector<16x128xf32>,
    } else {
    }
    %c0 = arith.constant 0 : index
    %c0_1 = arith.constant 0 : index
    %3 = vector.load %arg6[%c0, %c0_1] : memref<16x128xf32, #tpu.memory_space<vmem>>, vector<16x128xf32>
    %c0_2 = arith.constant 0 : index
    %c0_3 = arith.constant 0 : index
    %4 = vector.load %arg2[%c0_2, %c0_3] : memref<16x256xf32, #tpu.memory_space<vmem>>, vector<16x256xf32>
    %c0_4 = arith.constant 0 : index
    %c0_5 = arith.constant 0 : index
    %5 = vector.load %arg3[%c0_4, %c0_5] : memref<256x128xf32, #tpu.memory_space<vmem>>, vector<256x128xf32>
    %cst = arith.constant dense<0.000000e+00> : vector<16x128xf32>
    %6 = tpu.matmul %4, %5, %cst {dimension_numbers = #tpu.dot_dimension_numbers<[1], [0], [0], [1], [0, 0, 1, 1], [], []>} : vector<16x256xf32>, vector<256x128xf32>, vector<16x128xf32> -> vector<16x128xf32>
    %7 = arith.addf %3, %6 : vector<16x128xf32>
    %c0_6 = arith.constant 0 : index
    %c0_7 = arith.constant 0 : index
    %8 = vector.load %arg6[%c0_6, %c0_7] : memref<16x128xf32, #tpu.memory_space<vmem>>, vector<16x128xf32>
    tpu.vector_store %arg6[%c0_6, %c0_7], %7 {strides = array<i32>} : memref<16x128xf32, #tpu.memory_space<vmem>>, vector<16x128xf32>,
    %c0_i32_8 = arith.constant 0 : i32
    %9 = arith.cmpi eq, %arg1, %c0_i32_8 : i32
    %10 = arith.extui %9 : i1 to i32
    %c0_i32_9 = arith.constant 0 : i32
    %11 = arith.cmpi ne, %10, %c0_i32_9 : i32
    scf.if %11 {
      %c0_10 = arith.constant 0 : index
      %c0_11 = arith.constant 0 : index
      %12 = vector.load %arg6[%c0_10, %c0_11] : memref<16x128xf32, #tpu.memory_space<vmem>>, vector<16x128xf32>
      %c0_12 = arith.constant 0 : index
      %c0_13 = arith.constant 0 : index
      %13 = vector.load %arg4[%c0_12, %c0_13] : memref<16x128xf32, #tpu.memory_space<vmem>>, vector<16x128xf32>
      %14 = arith.mulf %12, %13 : vector<16x128xf32>
      %c0_14 = arith.constant 0 : index
      %c0_15 = arith.constant 0 : index
      %15 = vector.load %arg5[%c0_14, %c0_15] : memref<16x128xf32, #tpu.memory_space<vmem>>, vector<16x128xf32>
      tpu.vector_store %arg5[%c0_14, %c0_15], %14 {strides = array<i32>} : memref<16x128xf32, #tpu.memory_space<vmem>>, vector<16x128xf32>,
    } else {
    }
    return
  }
  func.func @transform_0(%arg0: i32, %arg1: i32) -> (i32, i32) {
    %c0_i32 = arith.constant 0 : i32
    return %arg0, %arg1 : i32, i32
  }
  func.func @transform_1(%arg0: i32, %arg1: i32) -> (i32, i32) {
    %c0_i32 = arith.constant 0 : i32
    %c0_i32_0 = arith.constant 0 : i32
    return %arg1, %c0_i32 : i32, i32
  }
  func.func @transform_2(%arg0: i32, %arg1: i32) -> (i32, i32) {
    %c0_i32 = arith.constant 0 : i32
    %c0_i32_0 = arith.constant 0 : i32
    return %arg0, %c0_i32 : i32, i32
  }
  func.func @transform_3(%arg0: i32, %arg1: i32) -> (i32, i32) {
    %c0_i32 = arith.constant 0 : i32
    %c0_i32_0 = arith.constant 0 : i32
    return %arg0, %c0_i32 : i32, i32
  }
}

</mosaic_0001>

<bundles_post_ra>
// kernel: _lora_shrink.1
= control target key start
LH: loop header
LB: loop body
LE: loop exit
PB: predicated region body
PF: predicated region fallthrough
CT: control target
= control target key end

     0   :  { %8 = vsyncpa [#allocation4], 0  ;;  %s421_s0 = inlined_call_operand.hbm [shape: f32[16,256], index: 0, kind: input, shape index: {}]   ;;  %s422_s1 = inlined_call_operand.hbm [shape: f32[256,128], index: 1, kind: input, shape index: {}]   ;;  %s423_s2 = inlined_call_operand.hbm [shape: f32[16,128], index: 2, kind: input, shape index: {}]   ;;  %s424_s3 = inlined_call_operand.hbm [shape: f32[16,128], index: 3, kind: output, shape index: {}]  }
   0x1   :  { %9 = vsyncpa [#allocation7], 0 }
   0x2   :  { %10 = vsyncpa [#allocation5], 0  ;;  %s372_s12 = smov [#allocation6]  }
   0x3   :  { %s28_s13 = sshll.u32 %s372_s12, 4  ;;  %s29_s13 = int_to_ptr.vmem [resolvable:$true] %s28_s13 }
   0x4   :  { %s294_s14 = scalar_lea.vmem %s29_s13, 4096  ;;  %p299_p1 = scmp.lt.s32.totalorder %s29_s13, %s29_s13 }
   0x5   :  { %p295_p0 = scmp.ne.s32.totalorder %s29_s13, %s294_s14  ;;  %p300_p2 = scmp.lt.s32.totalorder %s294_s14, %s294_s14 }
   0x7   :  { %p301_p3 = por %p300_p2, %p299_p1 }
   0x9   :  { %p302_p4 = pnand %p301_p3, %p295_p0 }
   0xb   :  { %305 = shalt.err (!%p302_p4)
}
   0xc   :  { %s373_s15 = smov 128   ;;  %s374_s16 = smov 8  }
   0xd   :  { %34 = dma.hbm_to_vmem [thread:$0]  %s422_s1, 4096, %s29_s13, [#allocation7], %s373_s15, %s373_s15, %s374_s16  }
   0xe   :  { %s375_s19 = smov [#allocation3]  }
   0xf   :  { %s16_s20 = sshll.u32 %s375_s19, 4  ;;  %s17_s20 = int_to_ptr.vmem [resolvable:$true] %s16_s20 }
  0x10   :  { %s314_s21 = scalar_lea.vmem %s17_s20, 512  ;;  %p319_p6 = scmp.lt.s32.totalorder %s17_s20, %s17_s20 }
  0x11   :  { %p315_p5 = scmp.ne.s32.totalorder %s17_s20, %s314_s21  ;;  %p320_p7 = scmp.lt.s32.totalorder %s314_s21, %s314_s21 }
  0x13   :  { %p321_p8 = por %p320_p7, %p319_p6 }
  0x15   :  { %p322_p9 = pnand %p321_p8, %p315_p5 }
  0x17   :  { %325 = shalt.err (!%p322_p9)
}
  0x18   :  { %s376_s22 = smov 256   ;;  %s377_s23 = smov 16  }
  0x19   :  { %22 = dma.hbm_to_vmem [thread:$0]  %s421_s0, 512, %s17_s20, [#allocation4], %s376_s22, %s376_s22, %s377_s23  }
  0x1a   :  { %s378_s26 = smov [#allocation8]  }
  0x1b   :  { %s40_s27 = sshll.u32 %s378_s26, 4  ;;  %s41_s27 = int_to_ptr.vmem [resolvable:$true] %s40_s27 }
  0x1c   :  { %s334_s1 = scalar_lea.vmem %s41_s27, 256  ;;  %p339_p11 = scmp.lt.s32.totalorder %s41_s27, %s41_s27 }
  0x1d   :  { %p335_p10 = scmp.ne.s32.totalorder %s41_s27, %s334_s1  ;;  %p340_p12 = scmp.lt.s32.totalorder %s334_s1, %s334_s1 }
  0x1f   :  { %p341_p13 = por %p340_p12, %p339_p11 }
  0x21   :  { %p342_p0 = pnand %p341_p13, %p335_p10 }
  0x23   :  { %345 = shalt.err (!%p342_p0)
}
  0x24   :  { %46 = dma.hbm_to_vmem [thread:$0]  %s423_s2, 256, %s41_s27, [#allocation7], %s373_s15, %s373_s15, %s374_s16  }
  0x25   :  { %366 = dma.done.wait [#allocation4], 512  }
  0x26   :  { %367 = vsyncadd [#allocation4], 4294966784 }
  0x27   :  { %368 = dma.done.wait [#allocation7], 4352  }
  0x28   :  { %369 = vsyncadd [#allocation7], 4294962944  ;;  %v99_v0 = vld [vmem:[#allocation6 + $0xf8] sm:$0xff]  ;;  %v98_v2 = vld [vmem:[#allocation6 + $0xf0] sm:$0xff]  ;;  %s379_s0 = smov [#allocation9]  }
  0x29   :  { %v83_v1 = vld [vmem:[#allocation6 + $0x78] sm:$0xff]  ;;  %208 = vmatprep.subr.mxu0 %v99_v0  ;;  %246 = vmatprep.subr.mxu1 %v99_v0  ;;  %v82_v3 = vld [vmem:[#allocation6 + $0x70] sm:$0xff]  ;;  %v97_v4 = vld [vmem:[#allocation6 + $0xe8] sm:$0xff]  ;;  %s195_s2 = sshll.u32 %s379_s0, 4  ;;  %s196_s2 = int_to_ptr.vmem [resolvable:$true] %s195_s2 }
  0x2a   :  { %209 = vmatpush3.msra.mxu0 %v83_v1  ;;  %262 = vmatpush3.msra.mxu1 %v83_v1  ;;  %v81_v5 = vld [vmem:[#allocation6 + $0x68] sm:$0xff]  ;;  %v96_v6 = vld [vmem:[#allocation6 + $0xe0] sm:$0xff]  ;;  %v95_v8 = vld [vmem:[#allocation6 + $0xd8] sm:$0xff]  ;;  %s346_s30 = scalar_lea.vmem %s196_s2, 256  ;;  %p351_p2 = scmp.lt.s32.totalorder %s196_s2, %s196_s2 }
  0x2b   :  { %210 = vmatprep.subr.mxu0 %v98_v2  ;;  %247 = vmatprep.subr.mxu1 %v98_v2  ;;  %v80_v7 = vld [vmem:[#allocation6 + $0x60] sm:$0xff]  ;;  %v79_v9 = vld [vmem:[#allocation6 + $0x58] sm:$0xff]  ;;  %v94_v10 = vld [vmem:[#allocation6 + $0xd0] sm:$0xff]  ;;  %p347_p1 = scmp.ne.s32.totalorder %s196_s2, %s346_s30  ;;  %p352_p3 = scmp.lt.s32.totalorder %s346_s30, %s346_s30 }
  0x2c   :  { %211 = vmatpush3.msra.mxu0 %v82_v3  ;;  %263 = vmatpush3.msra.mxu1 %v82_v3  ;;  %v78_v11 = vld [vmem:[#allocation6 + $0x50] sm:$0xff]  ;;  %v93_v12 = vld [vmem:[#allocation6 + $0xc8] sm:$0xff]  ;;  %v92_v14 = vld [vmem:[#allocation6 + $0xc0] sm:$0xff] }
  0x2d   :  { %212 = vmatprep.subr.mxu0 %v97_v4  ;;  %248 = vmatprep.subr.mxu1 %v97_v4  ;;  %v77_v13 = vld [vmem:[#allocation6 + $0x48] sm:$0xff]  ;;  %v76_v15 = vld [vmem:[#allocation6 + $0x40] sm:$0xff]  ;;  %v91_v16 = vld [vmem:[#allocation6 + $0xb8] sm:$0xff]  ;;  %p353_p4 = por %p352_p3, %p351_p2 }
  0x2e   :  { %213 = vmatpush3.msra.mxu0 %v81_v5  ;;  %264 = vmatpush3.msra.mxu1 %v81_v5  ;;  %v75_v17 = vld [vmem:[#allocation6 + $0x38] sm:$0xff]  ;;  %v90_v18 = vld [vmem:[#allocation6 + $0xb0] sm:$0xff]  ;;  %v89_v20 = vld [vmem:[#allocation6 + $0xa8] sm:$0xff] }
  0x2f   :  { %214 = vmatprep.subr.mxu0 %v96_v6  ;;  %249 = vmatprep.subr.mxu1 %v96_v6  ;;  %v74_v19 = vld [vmem:[#allocation6 + $0x30] sm:$0xff]  ;;  %v73_v21 = vld [vmem:[#allocation6 + $0x28] sm:$0xff]  ;;  %v88_v22 = vld [vmem:[#allocation6 + $0xa0] sm:$0xff]  ;;  %p354_p5 = pnand %p353_p4, %p347_p1 }
  0x30   :  { %215 = vmatpush3.msra.mxu0 %v80_v7  ;;  %265 = vmatpush3.msra.mxu1 %v80_v7  ;;  %v72_v23 = vld [vmem:[#allocation6 + $0x20] sm:$0xff]  ;;  %v87_v24 = vld [vmem:[#allocation6 + $0x98] sm:$0xff]  ;;  %v86_v26 = vld [vmem:[#allocation6 + $0x90] sm:$0xff] }
  0x31   :  { %216 = vmatprep.subr.mxu0 %v95_v8  ;;  %250 = vmatprep.subr.mxu1 %v95_v8  ;;  %v71_v25 = vld [vmem:[#allocation6 + $0x18] sm:$0xff]  ;;  %v70_v27 = vld [vmem:[#allocation6 + $0x10] sm:$0xff]  ;;  %v85_v28 = vld [vmem:[#allocation6 + $0x88] sm:$0xff] }
  0x32   :  { %217 = vmatpush3.msra.mxu0 %v79_v9  ;;  %266 = vmatpush3.msra.mxu1 %v79_v9  ;;  %v69_v29 = vld [vmem:[#allocation6 + $0x8] sm:$0xff]  ;;  %v84_v30 = vld [vmem:[#allocation6 + $0x80] sm:$0xff]  ;;  %v67_v33 = vld [vmem:[#allocation3 + $0x18] sm:$0xff] }
  0x33   :  { %218 = vmatprep.subr.mxu0 %v94_v10  ;;  %251 = vmatprep.subr.mxu1 %v94_v10  ;;  %v68_v31 = vld [vmem:[#allocation6] sm:$0xff]  ;;  %v65_v32 = vld [vmem:[#allocation3 + $0x8] sm:$0xff]  ;;  %v66_v35 = vld [vmem:[#allocation3 + $0x10] sm:$0xff] }
  0x34   :  { %219 = vmatpush3.msra.mxu0 %v78_v11  ;;  %267 = vmatpush3.msra.mxu1 %v78_v11  ;;  %v64_v34 = vld [vmem:[#allocation3] sm:$0xff]  ;;  %v185_v41 = vld [vmem:[#allocation8 + $0x8] sm:$0xff] }
  0x35   :  { %220 = vmatprep.subr.mxu0 %v93_v12  ;;  %252 = vmatprep.subr.mxu1 %v93_v12  ;;  %v184_v39 = vld [vmem:[#allocation8] sm:$0xff] }
  0x36   :  { %221 = vmatpush3.msra.mxu0 %v77_v13  ;;  %268 = vmatpush3.msra.mxu1 %v77_v13 }
  0x37   :  { %222 = vmatprep.subr.mxu0 %v92_v14  ;;  %253 = vmatprep.subr.mxu1 %v92_v14 }
  0x38   :  { %223 = vmatpush3.msra.mxu0 %v76_v15  ;;  %269 = vmatpush3.msra.mxu1 %v76_v15 }
  0x39   :  { %224 = vmatprep.subr.mxu0 %v91_v16  ;;  %254 = vmatprep.subr.mxu1 %v91_v16 }
  0x3a   :  { %225 = vmatpush3.msra.mxu0 %v75_v17  ;;  %270 = vmatpush3.msra.mxu1 %v75_v17 }
  0x3b   :  { %226 = vmatprep.subr.mxu0 %v90_v18  ;;  %255 = vmatprep.subr.mxu1 %v90_v18 }
  0x3c   :  { %227 = vmatpush3.msra.mxu0 %v74_v19  ;;  %271 = vmatpush3.msra.mxu1 %v74_v19 }
  0x3d   :  { %228 = vmatprep.subr.mxu0 %v89_v20  ;;  %256 = vmatprep.subr.mxu1 %v89_v20 }
  0x3e   :  { %229 = vmatpush3.msra.mxu0 %v73_v21  ;;  %272 = vmatpush3.msra.mxu1 %v73_v21 }
  0x3f   :  { %230 = vmatprep.subr.mxu0 %v88_v22  ;;  %257 = vmatprep.subr.mxu1 %v88_v22 }
  0x40   :  { %231 = vmatpush3.msra.mxu0 %v72_v23  ;;  %273 = vmatpush3.msra.mxu1 %v72_v23 }
  0x41   :  { %232 = vmatprep.subr.mxu0 %v87_v24  ;;  %258 = vmatprep.subr.mxu1 %v87_v24 }
  0x42   :  { %233 = vmatpush3.msra.mxu0 %v71_v25  ;;  %274 = vmatpush3.msra.mxu1 %v71_v25 }
  0x43   :  { %234 = vmatprep.subr.mxu0 %v86_v26  ;;  %259 = vmatprep.subr.mxu1 %v86_v26 }
  0x44   :  { %235 = vmatpush3.msra.mxu0 %v70_v27  ;;  %275 = vmatpush3.msra.mxu1 %v70_v27 }
  0x45   :  { %236 = vmatprep.subr.mxu0 %v85_v28  ;;  %260 = vmatprep.subr.mxu1 %v85_v28 }
  0x46   :  { %237 = vmatpush3.msra.mxu0 %v69_v29  ;;  %276 = vmatpush3.msra.mxu1 %v69_v29 }
  0x47   :  { %238 = vmatprep.subr.mxu0 %v84_v30  ;;  %261 = vmatprep.subr.mxu1 %v84_v30 }
  0x48   :  { %239 = vmatpush3.msra.mxu0 %v68_v31  ;;  %277 = vmatpush3.msra.mxu1 %v68_v31 }
  0x49   :  { %164 = vmatprep.mubr.f32.mxu0 %v65_v32  ;;  %169 = vmatprep.mubr.f32.mxu1 %v67_v33 }
  0x4a   :  { %165 = vmatmul.mubr.f32.vlgmr.msra.gmra.mxu0 %v64_v34  ;;  %170 = vmatmul.mubr.f32.vlgmr.msra.gmra.mxu1 %v66_v35 }
 0x10a   :  { %v240_v36 = vpop.f32.mrf.mxu0  ;;  %v243_v37 = vpop.f32.mrf.mxu1 }
 0x10c   :  { %v241_v38 = vpop.f32.mrf.mxu0  ;;  %v244_v40 = vpop.f32.mrf.mxu1 }
 0x10d   :  { %v242_v42 = vadd.f32 %v241_v38, %v240_v36  ;;  %v245_v43 = vadd.f32 %v244_v40, %v243_v37 }
 0x10f   :  { %v186_v44 = vmul.f32 %v242_v42, %v184_v39  ;;  %v187_v45 = vmul.f32 %v245_v43, %v185_v41 }
 0x111   :  { %188 = vst [vmem:[#allocation9] sm:$0xff] %v186_v44  ;;  %189 = vst [vmem:[#allocation9 + $0x8] sm:$0xff] %v187_v45 }
 0x112   :  { %357 = shalt.err (!%p354_p5)
}
 0x113   :  { %201 = dma.vmem_to_hbm [thread:$0]  %s196_s2, 256, %s424_s3, [#allocation5], %s373_s15, %s373_s15, %s374_s16  }
 0x114   :  { %370 = dma.done.wait [#allocation5], 256  }
 0x115   :  { %371 = vsyncadd [#allocation5], 4294967040 }
 0x116   :  { %205 = vsyncpa [#allocation4], 1 }
 0x117   :  { %206 = vsyncpa [#allocation7], 1 }
 0x118   :  { %207 = vsyncpa [#allocation5], 1 }

</bundles_post_ra>
